<compile_context>
chip_gen: v7x
topology: tpu7x:2x2x1
jax: 0.10.0
libtpu: 0.0.40
codegen_flags: <defaults>
</compile_context>

<pallas_src>
import functools

import jax
import jax.numpy as jnp
from jax.experimental import pallas as pl
from jax.experimental.pallas import tpu as pltpu


# ----------------------------------------------------------------------------
# Fused kernel: 3 lane-dense matmuls + psi combine.
# ----------------------------------------------------------------------------
def _psi_critic2_fused_kernel(x_ref, w1_ref, b1_ref, w2_ref, b2_ref,
                              w3_ref, b3_ref, out_ref, *, a_dim, sf_dim):
    f32 = jnp.float32
    bf16 = jnp.bfloat16

    x = x_ref[...].astype(bf16)

    # Layer 1: all H = a_dim + 1 heads at once, lane-dense (B, H*fc).
    h1 = jnp.dot(x, w1_ref[...], preferred_element_type=f32)
    h1 = jnp.maximum(h1 + b1_ref[...], 0.0)

    # Layer 2: block-diagonal across heads -> one matmul, stays lane-dense.
    h2 = jnp.dot(h1.astype(bf16), w2_ref[...], preferred_element_type=f32)
    h2 = jnp.maximum(h2 + b2_ref[...], 0.0)

    # Layer 3: block-diagonal; output lane layout is
    #   lanes [0, a_dim*sf)          : the a_dim advantage heads
    #   lanes [a_dim*sf, 2*a_dim*sf) : the state head, replicated a_dim times
    y = jnp.dot(h2.astype(bf16), w3_ref[...], preferred_element_type=f32)
    y = y + b3_ref[...]

    n_adv = a_dim * sf_dim
    adv = y[:, :n_adv]                      # (B, a_dim*sf)  lane-dense
    state_tiled = y[:, n_adv:]              # (B, a_dim*sf)  state per chunk

    # Tiled sum over advantage heads.  Summing the full cyclic group of
    # sf-lane shifts puts the head-sum in EVERY sf-lane chunk (so the mean is
    # already broadcast per head).  Rolls run on the XLU slot.
    if n_adv % 128 == 0:
        adv_sum = adv
        for h in range(1, a_dim):
            adv_sum = adv_sum + pltpu.roll(adv, shift=h * sf_dim, axis=1)
    else:
        # Fallback for non-vreg-aligned widths: explicit chunk sum + tile.
        chunk_sum = adv[:, :sf_dim]
        for h in range(1, a_dim):
            chunk_sum = chunk_sum + adv[:, h * sf_dim:(h + 1) * sf_dim]
        adv_sum = jnp.concatenate([chunk_sum] * a_dim, axis=-1)

    psi = adv + state_tiled - adv_sum * (1.0 / a_dim)

    # Single lane-dense output slab: [ psi | adv | state ].
    out_ref[:, :n_adv] = psi.astype(out_ref.dtype)
    out_ref[:, n_adv:2 * n_adv] = adv.astype(out_ref.dtype)
    out_ref[:, 2 * n_adv:] = state_tiled[:, :sf_dim].astype(out_ref.dtype)


def run_psi_critic2_fused(x, w1_cat, b1_cat, w2_blk, b2_cat, w3_blk, b3_cat,
                          *, a_dim, sf_dim, batch_tile=None):
    """x: (B, sf).  w1_cat: (sf, H*fc) bf16, b1_cat: (1, H*fc) f32,
    w2_blk: (H*fc, H*fc) bf16 block-diagonal, b2_cat: (1, H*fc) f32,
    w3_blk: (H*fc, 2*a_dim*sf) bf16, b3_cat: (1, 2*a_dim*sf) f32,
    with H = a_dim + 1 (advantage heads first, state head last).
    Returns one (B, (2*a_dim+1)*sf) slab laid out as [psi | adv | state]."""
    B = x.shape[0]
    out_w = (2 * a_dim + 1) * sf_dim
    kern = functools.partial(_psi_critic2_fused_kernel,
                             a_dim=a_dim, sf_dim=sf_dim)
    out_shape = jax.ShapeDtypeStruct((B, out_w), jnp.float32)
    args = (x, w1_cat, b1_cat, w2_blk, b2_cat, w3_blk, b3_cat)

    if batch_tile is None:
        batch_tile = B
        for cand in (512, 256, 128):
            if B > cand and B % cand == 0:
                batch_tile = cand
                break
    n_tiles = B // batch_tile

    if n_tiles <= 1:
        # Grid-less call: no 1-step pipeline prologue/epilogue, no pointless
        # double-buffering -- every operand sits whole in VMEM.
        return pl.pallas_call(kern, out_shape=out_shape)(*args)

    assert B % batch_tile == 0 and batch_tile % 8 == 0, \
        "batch_tile must divide B and be a multiple of 8"

    def full(a):
        return pl.BlockSpec(a.shape, lambda i, _n=a.ndim: (0,) * _n)

    return pl.pallas_call(
        kern,
        out_shape=out_shape,
        grid=(n_tiles,),
        in_specs=[
            pl.BlockSpec((batch_tile, x.shape[1]), lambda i: (i, 0)),   # x
            full(w1_cat), full(b1_cat),
            full(w2_blk), full(b2_cat),
            full(w3_blk), full(b3_cat),
        ],
        out_specs=pl.BlockSpec((batch_tile, out_w), lambda i: (i, 0)),
        compiler_params=pltpu.CompilerParams(
            dimension_semantics=("parallel",)),                # megacore on v7x
    )(*args)


# ----------------------------------------------------------------------------
# Parameter construction (deterministic, synthetic)
# ----------------------------------------------------------------------------
def init_psi_critic2_params(key, fc_dim, sf_dim, a_dim, num_options):
    """For each option: a_dim advantage MLPs + 1 state MLP, each
    sf_dim -> fc_dim -> fc_dim -> sf_dim.  Heads axis H = a_dim + 1
    (advantage heads first, state head last).  Also builds the fused kernel
    layout: layer-1 concatenated over heads, layers 2/3 block-diagonal, and
    the state head replicated a_dim times in the layer-3 output lanes."""
    H = a_dim + 1
    keys = jax.random.split(key, 6)
    scale = 0.1

    def w(k, shape):
        return (scale * jax.random.normal(k, shape)).astype(jnp.float32)

    w1 = w(keys[0], (num_options, H, sf_dim, fc_dim))
    b1 = w(keys[1], (num_options, H, fc_dim))
    w2 = w(keys[2], (num_options, H, fc_dim, fc_dim))
    b2 = w(keys[3], (num_options, H, fc_dim))
    w3 = w(keys[4], (num_options, H, fc_dim, sf_dim))
    b3 = w(keys[5], (num_options, H, sf_dim))

    # Layer 1: heads concatenated along the output (lane) dim.
    w1_cat = jnp.transpose(w1, (0, 2, 1, 3)).reshape(
        num_options, sf_dim, H * fc_dim)
    b1_cat = b1.reshape(num_options, 1, H * fc_dim)

    # Layer 2: block-diagonal (H*fc, H*fc).
    eyeH = jnp.eye(H, dtype=jnp.float32)
    w2_blk = jnp.einsum('hg,ohrc->ohrgc', eyeH, w2).reshape(
        num_options, H * fc_dim, H * fc_dim)
    b2_cat = b2.reshape(num_options, 1, H * fc_dim)

    # Layer 3: advantage heads block-diagonal into lanes [0, a_dim*sf);
    # state head replicated a_dim times into lanes [a_dim*sf, 2*a_dim*sf).
    eyeA = jnp.eye(a_dim, dtype=jnp.float32)
    adv_cols = jnp.einsum('hg,ohrc->ohrgc', eyeA, w3[:, :a_dim]).reshape(
        num_options, a_dim * fc_dim, a_dim * sf_dim)
    adv_cols = jnp.concatenate(
        [adv_cols,
         jnp.zeros((num_options, fc_dim, a_dim * sf_dim), jnp.float32)],
        axis=1)                                            # (O, H*fc, a*sf)
    state_cols = jnp.concatenate(
        [jnp.zeros((num_options, a_dim * fc_dim, a_dim * sf_dim), jnp.float32),
         jnp.tile(w3[:, a_dim], (1, 1, a_dim))],
        axis=1)                                            # (O, H*fc, a*sf)
    w3_blk = jnp.concatenate([adv_cols, state_cols], axis=2)

    b3_adv = b3[:, :a_dim].reshape(num_options, 1, a_dim * sf_dim)
    b3_state = jnp.tile(b3[:, a_dim], (1, a_dim)).reshape(
        num_options, 1, a_dim * sf_dim)
    b3_cat = jnp.concatenate([b3_adv, b3_state], axis=2)

    bf16 = jnp.bfloat16
    return {
        # Original per-head f32 weights (kept for the pure-JAX reference).
        "w1": w1, "b1": b1, "w2": w2, "b2": b2, "w3": w3, "b3": b3,
        # Fused / block-diagonal kernel layout (weights bf16, biases f32).
        "w1_cat": w1_cat.astype(bf16), "b1_cat": b1_cat,
        "w2_blk": w2_blk.astype(bf16), "b2_cat": b2_cat,
        "w3_blk": w3_blk.astype(bf16), "b3_cat": b3_cat,
    }


# ----------------------------------------------------------------------------
# Forward (mirrors PsiCritic2.forward(x, z))
# ----------------------------------------------------------------------------
def psi_critic2_forward(params, x, z, a_dim, *, batch_tile=None):
    # z is a static Python int (PyTorch indexes an nn.ModuleList), so the
    # option's weights are selected with a static slice at trace time.
    # TODO(synk): if z ever becomes traced, pass it via num_scalar_prefetch=1
    # and index the option axis of the full weight arrays in BlockSpec
    # index_maps instead of slicing params[...][z] here.
    B, sf = x.shape
    out = run_psi_critic2_fused(
        x,
        params["w1_cat"][z], params["b1_cat"][z],
        params["w2_blk"][z], params["b2_cat"][z],
        params["w3_blk"][z], params["b3_cat"][z],
        a_dim=a_dim, sf_dim=sf, batch_tile=batch_tile)
    n = a_dim * sf
    psi = out[:, :n].reshape(B, a_dim, sf)
    psi_advantage = out[:, n:2 * n].reshape(B, a_dim, sf)
    psi_state = out[:, 2 * n:]
    return psi, {"psiState": psi_state, "psiAdvantage": psi_advantage}


# ----------------------------------------------------------------------------
# Pure-JAX reference (correctness check; f32, per-head weights)
# ----------------------------------------------------------------------------
def _ref_forward(params, x, z, a_dim):
    def mlp(xx, w1, b1, w2, b2, w3, b3):
        h = jnp.maximum(xx @ w1 + b1, 0.0)
        h = jnp.maximum(h @ w2 + b2, 0.0)
        return h @ w3 + b3

    outs = []
    for h in range(a_dim + 1):
        outs.append(mlp(x,
                        params["w1"][z, h], params["b1"][z, h],
                        params["w2"][z, h], params["b2"][z, h],
                        params["w3"][z, h], params["b3"][z, h]))
    adv = jnp.stack(outs[:a_dim], axis=1)          # (B, a_dim, sf)
    state = outs[a_dim]                            # (B, sf)
    psi = state[:, None, :] + adv - jnp.mean(adv, axis=1, keepdims=True)
    return psi, state, adv


if __name__ == "__main__":
    # Small shapes consistent with the module.
    B = 8
    sf_dim = 32
    fc_dim = 32
    a_dim = 4            # a_dim * sf_dim = 128 -> lane-dense outputs
    num_options = 2
    z = 1

    key = jax.random.PRNGKey(0)
    kx, kp, kb = jax.random.split(key, 3)
    x = jax.random.normal(kx, (B, sf_dim), dtype=jnp.float32)
    params = init_psi_critic2_params(kp, fc_dim, sf_dim, a_dim, num_options)

    # --- grid-less path (small batch) ---
    psi, aux = psi_critic2_forward(params, x, z, a_dim)
    psi = jax.block_until_ready(psi)
    psi_state = jax.block_until_ready(aux["psiState"])
    psi_adv = jax.block_until_ready(aux["psiAdvantage"])

    psi_r, state_r, adv_r = _ref_forward(params, x, z, a_dim)
    # bf16 weights / activations -> loosened tolerance.
    tol = dict(atol=3e-2, rtol=3e-2)
    assert jnp.allclose(psi, psi_r, **tol)
    assert jnp.allclose(psi_state, state_r, **tol)
    assert jnp.allclose(psi_adv, adv_r, **tol)
    assert psi.shape == (B, a_dim, sf_dim)
    assert psi_state.shape == (B, sf_dim)
    assert psi_adv.shape == (B, a_dim, sf_dim)

    # --- batch-tiled "parallel" grid path (amortizes launch overhead,
    #     shards across TensorCores on v7x) ---
    Bb = 32
    xb = jax.random.normal(kb, (Bb, sf_dim), dtype=jnp.float32)
    psi_b, aux_b = psi_critic2_forward(params, xb, 0, a_dim, batch_tile=8)
    psi_b = jax.block_until_ready(psi_b)
    psi_rb, state_rb, adv_rb = _ref_forward(params, xb, 0, a_dim)
    assert jnp.allclose(psi_b, psi_rb, **tol)
    assert jnp.allclose(aux_b["psiState"], state_rb, **tol)
    assert jnp.allclose(aux_b["psiAdvantage"], adv_rb, **tol)

    print("KERNEL_OK")
</pallas_src>

<mosaic_0001>
module attributes {stable_mosaic.version = 11 : i64} {
  func.func @_psi_critic2_fused_kernel(%arg0: memref<8x32xf32, #tpu.memory_space<vmem>>, %arg1: memref<32x160xbf16, #tpu.memory_space<vmem>>, %arg2: memref<1x160xf32, #tpu.memory_space<vmem>>, %arg3: memref<160x160xbf16, #tpu.memory_space<vmem>>, %arg4: memref<1x160xf32, #tpu.memory_space<vmem>>, %arg5: memref<160x256xbf16, #tpu.memory_space<vmem>>, %arg6: memref<1x256xf32, #tpu.memory_space<vmem>>, %arg7: memref<8x288xf32, #tpu.memory_space<vmem>>) attributes {dimension_semantics = [], scalar_prefetch = 0 : i64, scratch_operands = 0 : i64, tpu.core_type = #tpu.core_type<tc>} {
    %c0 = arith.constant 0 : index
    %c0_0 = arith.constant 0 : index
    %0 = vector.load %arg0[%c0, %c0_0] : memref<8x32xf32, #tpu.memory_space<vmem>>, vector<8x32xf32>
    %1 = arith.truncf %0 : vector<8x32xf32> to vector<8x32xbf16>
    %c0_1 = arith.constant 0 : index
    %c0_2 = arith.constant 0 : index
    %2 = vector.load %arg1[%c0_1, %c0_2] : memref<32x160xbf16, #tpu.memory_space<vmem>>, vector<32x160xbf16>
    %cst = arith.constant dense<0.000000e+00> : vector<8x160xf32>
    %3 = tpu.matmul %1, %2, %cst {dimension_numbers = #tpu.dot_dimension_numbers<[1], [0], [0], [1], [0, 0, 1, 1], [], []>} : vector<8x32xbf16>, vector<32x160xbf16>, vector<8x160xf32> -> vector<8x160xf32>
    %c0_3 = arith.constant 0 : index
    %c0_4 = arith.constant 0 : index
    %4 = vector.load %arg2[%c0_3, %c0_4] : memref<1x160xf32, #tpu.memory_space<vmem>>, vector<1x160xf32>
    %5 = vector.broadcast %4 : vector<1x160xf32> to vector<8x160xf32>
    %6 = arith.addf %3, %5 : vector<8x160xf32>
    %cst_5 = arith.constant 0.000000e+00 : f32
    %7 = vector.broadcast %cst_5 : f32 to vector<8x160xf32>
    %8 = arith.maximumf %6, %7 : vector<8x160xf32>
    %9 = arith.truncf %8 : vector<8x160xf32> to vector<8x160xbf16>
    %c0_6 = arith.constant 0 : index
    %c0_7 = arith.constant 0 : index
    %10 = vector.load %arg3[%c0_6, %c0_7] : memref<160x160xbf16, #tpu.memory_space<vmem>>, vector<160x160xbf16>
    %cst_8 = arith.constant dense<0.000000e+00> : vector<8x160xf32>
    %11 = tpu.matmul %9, %10, %cst_8 {dimension_numbers = #tpu.dot_dimension_numbers<[1], [0], [0], [1], [0, 0, 1, 1], [], []>} : vector<8x160xbf16>, vector<160x160xbf16>, vector<8x160xf32> -> vector<8x160xf32>
    %c0_9 = arith.constant 0 : index
    %c0_10 = arith.constant 0 : index
    %12 = vector.load %arg4[%c0_9, %c0_10] : memref<1x160xf32, #tpu.memory_space<vmem>>, vector<1x160xf32>
    %13 = vector.broadcast %12 : vector<1x160xf32> to vector<8x160xf32>
    %14 = arith.addf %11, %13 : vector<8x160xf32>
    %cst_11 = arith.constant 0.000000e+00 : f32
    %15 = vector.broadcast %cst_11 : f32 to vector<8x160xf32>
    %16 = arith.maximumf %14, %15 : vector<8x160xf32>
    %17 = arith.truncf %16 : vector<8x160xf32> to vector<8x160xbf16>
    %c0_12 = arith.constant 0 : index
    %c0_13 = arith.constant 0 : index
    %18 = vector.load %arg5[%c0_12, %c0_13] : memref<160x256xbf16, #tpu.memory_space<vmem>>, vector<160x256xbf16>
    %cst_14 = arith.constant dense<0.000000e+00> : vector<8x256xf32>
    %19 = tpu.matmul %17, %18, %cst_14 {dimension_numbers = #tpu.dot_dimension_numbers<[1], [0], [0], [1], [0, 0, 1, 1], [], []>} : vector<8x160xbf16>, vector<160x256xbf16>, vector<8x256xf32> -> vector<8x256xf32>
    %c0_15 = arith.constant 0 : index
    %c0_16 = arith.constant 0 : index
    %20 = vector.load %arg6[%c0_15, %c0_16] : memref<1x256xf32, #tpu.memory_space<vmem>>, vector<1x256xf32>
    %21 = vector.broadcast %20 : vector<1x256xf32> to vector<8x256xf32>
    %22 = arith.addf %19, %21 : vector<8x256xf32>
    %23 = vector.extract_strided_slice %22 {offsets = [0, 0], sizes = [8, 128], strides = [1, 1]} : vector<8x256xf32> to vector<8x128xf32>
    %24 = vector.extract_strided_slice %22 {offsets = [0, 128], sizes = [8, 128], strides = [1, 1]} : vector<8x256xf32> to vector<8x128xf32>
    %c32_i32 = arith.constant 32 : i32
    %25 = tpu.dynamic_rotate %23 by %c32_i32 dim 1 : vector<8x128xf32>, i32 -> vector<8x128xf32>
    %26 = arith.addf %23, %25 : vector<8x128xf32>
    %c64_i32 = arith.constant 64 : i32
    %27 = tpu.dynamic_rotate %23 by %c64_i32 dim 1 : vector<8x128xf32>, i32 -> vector<8x128xf32>
    %28 = arith.addf %26, %27 : vector<8x128xf32>
    %c96_i32 = arith.constant 96 : i32
    %29 = tpu.dynamic_rotate %23 by %c96_i32 dim 1 : vector<8x128xf32>, i32 -> vector<8x128xf32>
    %30 = arith.addf %28, %29 : vector<8x128xf32>
    %31 = arith.addf %23, %24 : vector<8x128xf32>
    %cst_17 = arith.constant 2.500000e-01 : f32
    %32 = vector.broadcast %cst_17 : f32 to vector<8x128xf32>
    %33 = arith.mulf %30, %32 : vector<8x128xf32>
    %34 = arith.subf %31, %33 : vector<8x128xf32>
    %c0_18 = arith.constant 0 : index
    %c0_19 = arith.constant 0 : index
    %35 = vector.load %arg7[%c0_18, %c0_19] : memref<8x288xf32, #tpu.memory_space<vmem>>, vector<8x128xf32>
    tpu.vector_store %arg7[%c0_18, %c0_19], %34 {strides = array<i32>} : memref<8x288xf32, #tpu.memory_space<vmem>>, vector<8x128xf32>,
    %c0_20 = arith.constant 0 : index
    %c128 = arith.constant 128 : index
    %36 = vector.load %arg7[%c0_20, %c128] : memref<8x288xf32, #tpu.memory_space<vmem>>, vector<8x128xf32>
    tpu.vector_store %arg7[%c0_20, %c128], %23 {strides = array<i32>} : memref<8x288xf32, #tpu.memory_space<vmem>>, vector<8x128xf32>,
    %37 = vector.extract_strided_slice %24 {offsets = [0, 0], sizes = [8, 32], strides = [1, 1]} : vector<8x128xf32> to vector<8x32xf32>
    %c0_21 = arith.constant 0 : index
    %c256 = arith.constant 256 : index
    %38 = vector.load %arg7[%c0_21, %c256] : memref<8x288xf32, #tpu.memory_space<vmem>>, vector<8x32xf32>
    tpu.vector_store %arg7[%c0_21, %c256], %37 {strides = array<i32>} : memref<8x288xf32, #tpu.memory_space<vmem>>, vector<8x32xf32>,
    return
  }
}

</mosaic_0001>

<bundles_post_ra>
// kernel: tpu_custom_call.1
= control target key start
LH: loop header
LB: loop body
LE: loop exit
PB: predicated region body
PF: predicated region fallthrough
CT: control target
= control target key end

     0   :  { %12 = vsyncpa [#allocation3], 0  ;;  %s931_s0 = inlined_call_operand.hbm [shape: f32[8,32], index: 0, kind: input, shape index: {}]   ;;  %s932_s1 = inlined_call_operand.hbm [shape: bf16[32,160], index: 1, kind: input, shape index: {}]   ;;  %s933_s2 = inlined_call_operand.vmem [shape: f32[1,160], index: 2, kind: input, shape index: {}]   ;;  %s934_s3 = inlined_call_operand.hbm [shape: bf16[160,160], index: 3, kind: input, shape index: {}]   ;;  %s935_s4 = inlined_call_operand.vmem [shape: f32[1,160], index: 4, kind: input, shape index: {}]   ;;  %s936_s5 = inlined_call_operand.hbm [shape: bf16[160,256], index: 5, kind: input, shape index: {}]   ;;  %s937_s6 = inlined_call_operand.vmem [shape: f32[1,256], index: 6, kind: input, shape index: {}]   ;;  %s938_s7 = inlined_call_operand.hbm [shape: f32[8,288], index: 7, kind: output, shape index: {}]  }
   0x1   :  { %13 = vsyncpa [#allocation6], 0 }
   0x2   :  { %14 = vsyncpa [#allocation9], 0 }
   0x3   :  { %15 = vsyncpa [#allocation4], 0  ;;  %s798_s24 = smov [#allocation5]   ;;  %s680_s28 = scalar_lea.hbm %s932_s1, 512 }
   0x4   :  { %s31_s25 = sshll.u32 %s798_s24, 4  ;;  %p681_p0 = scmp.ne.s32.totalorder %s932_s1, %s680_s28  ;;  %s32_s25 = int_to_ptr.vmem [resolvable:$true] %s31_s25 }
   0x5   :  { %p684_p1 = scmp.lt.u32.totalorder %s680_s28, %s932_s1 }
   0x7   :  { %p686_p2 = pnand %p684_p1, %p681_p0 }
   0x9   :  { %689 = shalt.err (!%p686_p2)
}
   0xa   :  { %s690_s10 = scalar_lea.vmem %s32_s25, 512  ;;  %p695_p4 = scmp.lt.s32.totalorder %s32_s25, %s32_s25 }
   0xb   :  { %p691_p3 = scmp.ne.s32.totalorder %s32_s25, %s690_s10  ;;  %p696_p5 = scmp.lt.s32.totalorder %s690_s10, %s690_s10 }
   0xd   :  { %p697_p6 = por %p696_p5, %p695_p4 }
   0xf   :  { %p698_p7 = pnand %p697_p6, %p691_p3 }
  0x11   :  { %701 = shalt.err (!%p698_p7)
}
  0x12   :  { %s799_s11 = smov 128   ;;  %s800_s12 = smov 8  }
  0x13   :  { %37 = dma.hbm_to_vmem [thread:$0]  %s932_s1, 512, %s32_s25, [#allocation6], %s799_s11, %s799_s11, %s800_s12  }
  0x14   :  { %s801_s15 = smov [#allocation2]   ;;  %s802_s17 = smov [#allocation7]  }
  0x15   :  { %s22_s16 = sshll.u32 %s801_s15, 4  ;;  %s45_s18 = sshll.u32 %s802_s17, 4  ;;  %s23_s16 = int_to_ptr.vmem [resolvable:$true] %s22_s16  ;;  %s46_s18 = int_to_ptr.vmem [resolvable:$true] %s45_s18 }
  0x16   :  { %s702_s21 = scalar_lea.hbm %s931_s0, 128 }
  0x17   :  { %p703_p8 = scmp.ne.s32.totalorder %s931_s0, %s702_s21  ;;  %p706_p9 = scmp.lt.u32.totalorder %s702_s21, %s931_s0 }
  0x19   :  { %p708_p10 = pnand %p706_p9, %p703_p8 }
  0x1b   :  { %711 = shalt.err (!%p708_p10)
}
  0x1c   :  { %s712_s1 = scalar_lea.vmem %s23_s16, 128  ;;  %p717_p12 = scmp.lt.s32.totalorder %s23_s16, %s23_s16 }
  0x1d   :  { %p713_p11 = scmp.ne.s32.totalorder %s23_s16, %s712_s1  ;;  %p718_p13 = scmp.lt.s32.totalorder %s712_s1, %s712_s1 }
  0x1f   :  { %p719_p0 = por %p718_p13, %p717_p12 }
  0x21   :  { %p720_p1 = pnand %p719_p0, %p713_p11 }
  0x23   :  { %723 = shalt.err (!%p720_p1)
}
  0x24   :  { %25 = dma.hbm_to_vmem [thread:$0]  %s931_s0, 128, %s23_s16, [#allocation3]  }
  0x25   :  { %s724_s30 = scalar_lea.hbm %s934_s3, 2560 }
  0x26   :  { %p725_p2 = scmp.ne.s32.totalorder %s934_s3, %s724_s30  ;;  %p728_p3 = scmp.lt.u32.totalorder %s724_s30, %s934_s3 }
  0x28   :  { %p730_p4 = pnand %p728_p3, %p725_p2 }
  0x2a   :  { %733 = shalt.err (!%p730_p4)
}
  0x2b   :  { %s734_s14 = scalar_lea.vmem %s46_s18, 2560  ;;  %p739_p6 = scmp.lt.s32.totalorder %s46_s18, %s46_s18 }
  0x2c   :  { %p735_p5 = scmp.ne.s32.totalorder %s46_s18, %s734_s14  ;;  %p740_p7 = scmp.lt.s32.totalorder %s734_s14, %s734_s14 }
  0x2e   :  { %p741_p8 = por %p740_p7, %p739_p6 }
  0x30   :  { %p742_p9 = pnand %p741_p8, %p735_p5 }
  0x32   :  { %745 = shalt.err (!%p742_p9)
}
  0x33   :  { %51 = dma.hbm_to_vmem [thread:$0]  %s934_s3, 2560, %s46_s18, [#allocation6], %s799_s11, %s799_s11, %s800_s12  }
  0x34   :  { %s803_s16 = smov [#allocation8]   ;;  %s746_s21 = scalar_lea.hbm %s936_s5, 2560 }
  0x35   :  { %s59_s17 = sshll.u32 %s803_s16, 4  ;;  %p747_p10 = scmp.ne.s32.totalorder %s936_s5, %s746_s21  ;;  %s60_s17 = int_to_ptr.vmem [resolvable:$true] %s59_s17 }
  0x36   :  { %p750_p11 = scmp.lt.u32.totalorder %s746_s21, %s936_s5 }
  0x38   :  { %p752_p12 = pnand %p750_p11, %p747_p10 }
  0x3a   :  { %755 = shalt.err (!%p752_p12)
}
  0x3b   :  { %s756_s1 = scalar_lea.vmem %s60_s17, 2560  ;;  %p761_p0 = scmp.lt.s32.totalorder %s60_s17, %s60_s17 }
  0x3c   :  { %p757_p13 = scmp.ne.s32.totalorder %s60_s17, %s756_s1  ;;  %p762_p1 = scmp.lt.s32.totalorder %s756_s1, %s756_s1 }
  0x3e   :  { %p763_p2 = por %p762_p1, %p761_p0 }
  0x40   :  { %p764_p3 = pnand %p763_p2, %p757_p13 }
  0x42   :  { %767 = shalt.err (!%p764_p3)
}
  0x43   :  { %65 = dma.hbm_to_vmem [thread:$0]  %s936_s5, 2560, %s60_s17, [#allocation9], %s799_s11, %s799_s11, %s800_s12  }
  0x44   :  { %790 = dma.done.wait [#allocation3], 128  }
  0x45   :  { %791 = vsyncadd [#allocation3], 4294967168 }
  0x46   :  { %792 = dma.done.wait [#allocation6], 3072  }
  0x47   :  { %793 = vsyncadd [#allocation6], 4294964224 }
  0x48   :  { %794 = dma.done.wait [#allocation9], 2560  }
  0x49   :  { %795 = vsyncadd [#allocation9], 4294964736  ;;  %v804_v0 = vmov 0   ;;  %v614_v1 = vld [vmem:[#allocation5 + $0x4] ss:$8 sps:$4 sm:$0xff]   ;;  %v81_v5 = vld [vmem:[#allocation2] sm:$0xff]  ;;  %v89_v43 = vlaneseq }
  0x4a   :  { %155 = vmatprep.mubr.bf16.mxu0 %v804_v0  ;;  %v616_v2 = vld [vmem:[#allocation5] ss:$8 sps:$4 sm:$0xff]   ;;  %123 = vmatprep.subr.bf16.mxu0 %v614_v1  ;;  %v617_v3 = vld [vmem:[#allocation5 + $0x14] ss:$8 sps:$4 sm:$0xff]   ;;  %v619_v4 = vld [vmem:[#allocation5 + $0x10] ss:$8 sps:$4 sm:$0xff]   ;;  %v82_v9 = vpack.c.bf16 %v81_v5, %v81_v5 }
  0x4b   :  { %124 = vmatpush1.bf16.msra.mxu0 %v616_v2  ;;  %v620_v6 = vld [vmem:[#allocation7 + $0x4] ss:$8 sps:$4 sm:$0xff]   ;;  %v622_v7 = vld [vmem:[#allocation7] ss:$8 sps:$4 sm:$0xff]   ;;  %v623_v8 = vld [vmem:[#allocation7 + $0x14] ss:$8 sps:$4 sm:$0xff]  }
  0x4c   :  { %125 = vmatprep.subr.bf16.mxu0 %v617_v3  ;;  %303 = vmatprep.subr.bf16.mxu1 %v620_v6  ;;  %v625_v10 = vld [vmem:[#allocation7 + $0x10] ss:$8 sps:$4 sm:$0xff]   ;;  %vm119_vm0 = vcmask 261120   ;;  %v626_v11 = vld [vmem:[#allocation7 + $0x24] ss:$8 sps:$4 sm:$0xff]   ;;  %v90_v44 = vshrl.u32 %v89_v43, 7 }
  0x4d   :  { %304 = vmatpush1.bf16.msra.mxu1 %v622_v7  ;;  %v628_v12 = vld [vmem:[#allocation7 + $0x20] ss:$8 sps:$4 sm:$0xff]   ;;  %v629_v13 = vld [vmem:[#allocation7 + $0x34] ss:$8 sps:$4 sm:$0xff]   ;;  %v631_v14 = vld [vmem:[#allocation7 + $0x30] ss:$8 sps:$4 sm:$0xff]  }
  0x4e   :  { %305 = vmatprep.subr.bf16.mxu1 %v623_v8  ;;  %v632_v15 = vld [vmem:[#allocation7 + $0x44] ss:$8 sps:$4 sm:$0xff]   ;;  %v634_v16 = vld [vmem:[#allocation7 + $0x40] ss:$8 sps:$4 sm:$0xff]   ;;  %v635_v17 = vld [vmem:[#allocation7 + $0x54] ss:$8 sps:$4 sm:$0xff]  }
  0x4f   :  { %126 = vmatpush1.bf16.msra.mxu0 %v619_v4  ;;  %v637_v18 = vld [vmem:[#allocation7 + $0x50] ss:$8 sps:$4 sm:$0xff]   ;;  %v638_v19 = vld [vmem:[#allocation7 + $0x64] ss:$8 sps:$4 sm:$0xff]   ;;  %v640_v20 = vld [vmem:[#allocation7 + $0x60] ss:$8 sps:$4 sm:$0xff]  }
  0x50   :  { %v641_v21 = vld [vmem:[#allocation7 + $0x74] ss:$8 sps:$4 sm:$0xff]   ;;  %v643_v22 = vld [vmem:[#allocation7 + $0x70] ss:$8 sps:$4 sm:$0xff]   ;;  %v644_v23 = vld [vmem:[#allocation7 + $0x84] ss:$8 sps:$4 sm:$0xff]  }
  0x51   :  { %306 = vmatpush1.bf16.msra.mxu1 %v625_v10  ;;  %v646_v24 = vld [vmem:[#allocation7 + $0x80] ss:$8 sps:$4 sm:$0xff]   ;;  %v647_v25 = vld [vmem:[#allocation7 + $0x94] ss:$8 sps:$4 sm:$0xff]   ;;  %v649_v26 = vld [vmem:[#allocation7 + $0x90] ss:$8 sps:$4 sm:$0xff]  }
  0x52   :  { %560 = vmatmul.mubr.msk.bf16.vlgmr.msra.gmra.mrb[0].mxu0 %vm119_vm0, %v82_v9  ;;  %307 = vmatprep.subr.bf16.mxu1 %v626_v11  ;;  %v650_v27 = vld [vmem:[#allocation8] ss:$8 sps:$4 sm:$0xff]   ;;  %v652_v28 = vld [vmem:[#allocation8 + $0x4] ss:$8 sps:$4 sm:$0xff]   ;;  %v655_v29 = vld [vmem:[#allocation8 + $0x14] ss:$8 sps:$4 sm:$0xff]  }
  0x53   :  { %483 = vmatprep.subr.bf16.mxu0 %v652_v28  ;;  %v653_v30 = vld [vmem:[#allocation8 + $0x10] ss:$8 sps:$4 sm:$0xff]   ;;  %v658_v31 = vld [vmem:[#allocation8 + $0x24] ss:$8 sps:$4 sm:$0xff]   ;;  %v656_v32 = vld [vmem:[#allocation8 + $0x20] ss:$8 sps:$4 sm:$0xff]  }
  0x54   :  { %484 = vmatpush1.bf16.msra.mxu0 %v650_v27  ;;  %v661_v33 = vld [vmem:[#allocation8 + $0x34] ss:$8 sps:$4 sm:$0xff]   ;;  %v659_v34 = vld [vmem:[#allocation8 + $0x30] ss:$8 sps:$4 sm:$0xff]   ;;  %v664_v35 = vld [vmem:[#allocation8 + $0x44] ss:$8 sps:$4 sm:$0xff]  }
  0x55   :  { %308 = vmatpush1.bf16.msra.mxu1 %v628_v12  ;;  %485 = vmatprep.subr.bf16.mxu0 %v655_v29  ;;  %v662_v36 = vld [vmem:[#allocation8 + $0x40] ss:$8 sps:$4 sm:$0xff]   ;;  %v667_v37 = vld [vmem:[#allocation8 + $0x54] ss:$8 sps:$4 sm:$0xff]   ;;  %v665_v38 = vld [vmem:[#allocation8 + $0x50] ss:$8 sps:$4 sm:$0xff]  }
  0x56   :  { %309 = vmatprep.subr.bf16.mxu1 %v629_v13  ;;  %v670_v39 = vld [vmem:[#allocation8 + $0x64] ss:$8 sps:$4 sm:$0xff]   ;;  %v668_v40 = vld [vmem:[#allocation8 + $0x60] ss:$8 sps:$4 sm:$0xff]   ;;  %v673_v41 = vld [vmem:[#allocation8 + $0x74] ss:$8 sps:$4 sm:$0xff]  }
  0x57   :  { %v671_v42 = vld [vmem:[#allocation8 + $0x70] ss:$8 sps:$4 sm:$0xff]   ;;  %v91_v45 = vsub.s32 0, %v90_v44  ;;  %v95_v47 = vsub.s32 1, %v90_v44  ;;  %v676_v60 = vld [vmem:[#allocation8 + $0x84] ss:$8 sps:$4 sm:$0xff]  }
  0x58   :  { %486 = vmatpush1.bf16.msra.mxu0 %v653_v30  ;;  %v87_v46 = vld [vmem:[%s933_s2] sm:$0x3]  ;;  %v674_v61 = vld [vmem:[#allocation8 + $0x80] ss:$8 sps:$4 sm:$0xff]   ;;  %v679_v62 = vld [vmem:[#allocation8 + $0x94] ss:$8 sps:$4 sm:$0xff]  }
  0x59   :  { %310 = vmatpush1.bf16.msra.mxu1 %v631_v14  ;;  %487 = vmatprep.subr.bf16.mxu0 %v658_v31  ;;  %v92_v48 = vrot.slane %v87_v46, %v91_v45  ;;  %v96_v49 = vrot.slane %v87_v46, %v95_v47  ;;  %v677_v63 = vld [vmem:[#allocation8 + $0x90] ss:$8 sps:$4 sm:$0xff]   ;;  %s806_s28 = smov 32   ;;  %s807_s29 = smov 64  }
  0x5a   :  { %311 = vmatprep.subr.bf16.mxu1 %v632_v15  ;;  %v188_v0 = vld [vmem:[%s935_s4] sm:$0x3]  ;;  %s805_s4 = smov 96  }
  0x5b   :  { %v193_v1 = vrot.slane %v188_v0, %v91_v45  ;;  %v197_v2 = vrot.slane %v188_v0, %v95_v47  ;;  %v368_v13 = vld [vmem:[%s937_s6] sm:$0x3]  ;;  %s808_s6 = smov [#allocation10]  }
  0x5c   :  { %488 = vmatpush1.bf16.msra.mxu0 %v656_v32  ;;  %v373_v14 = vrot.slane %v368_v13, %v91_v45  ;;  %v377_v15 = vrot.slane %v368_v13, %v95_v47  ;;  %s545_s30 = sshll.u32 %s808_s6, 4  ;;  %s546_s30 = int_to_ptr.vmem [resolvable:$true] %s545_s30 }
  0x5d   :  { %312 = vmatpush1.bf16.msra.mxu1 %v634_v16  ;;  %489 = vmatprep.subr.bf16.mxu0 %v661_v33  ;;  %s768_s8 = scalar_lea.vmem %s546_s30, 384  ;;  %p773_p5 = scmp.lt.s32.totalorder %s546_s30, %s546_s30 }
  0x5e   :  { %313 = vmatprep.subr.bf16.mxu1 %v635_v17  ;;  %p769_p4 = scmp.ne.s32.totalorder %s546_s30, %s768_s8  ;;  %p774_p6 = scmp.lt.s32.totalorder %s768_s8, %s768_s8 }
  0x60   :  { %490 = vmatpush1.bf16.msra.mxu0 %v659_v34  ;;  %p775_p7 = por %p774_p6, %p773_p5 }
  0x61   :  { %314 = vmatpush1.bf16.msra.mxu1 %v637_v18  ;;  %491 = vmatprep.subr.bf16.mxu0 %v664_v35 }
  0x62   :  { %315 = vmatprep.subr.bf16.mxu1 %v638_v19  ;;  %p776_p8 = pnand %p775_p7, %p769_p4 }
  0x64   :  { %492 = vmatpush1.bf16.msra.mxu0 %v662_v36 }
  0x65   :  { %316 = vmatpush1.bf16.msra.mxu1 %v640_v20  ;;  %493 = vmatprep.subr.bf16.mxu0 %v667_v37 }
  0x66   :  { %317 = vmatprep.subr.bf16.mxu1 %v641_v21 }
  0x68   :  { %494 = vmatpush1.bf16.msra.mxu0 %v665_v38 }
  0x69   :  { %318 = vmatpush1.bf16.msra.mxu1 %v643_v22  ;;  %495 = vmatprep.subr.bf16.mxu0 %v670_v39 }
  0x6a   :  { %319 = vmatprep.subr.bf16.mxu1 %v644_v23 }
  0x6c   :  { %496 = vmatpush1.bf16.msra.mxu0 %v668_v40 }
  0x6d   :  { %320 = vmatpush1.bf16.msra.mxu1 %v646_v24  ;;  %497 = vmatprep.subr.bf16.mxu0 %v673_v41 }
  0x6e   :  { %321 = vmatprep.subr.bf16.mxu1 %v647_v25 }
  0x70   :  { %498 = vmatpush1.bf16.msra.mxu0 %v671_v42 }
  0x71   :  { %322 = vmatpush1.bf16.msra.mxu1 %v649_v26  ;;  %499 = vmatprep.subr.bf16.mxu0 %v676_v60 }
  0x74   :  { %500 = vmatpush1.bf16.msra.mxu0 %v674_v61 }
  0x75   :  { %501 = vmatprep.subr.bf16.mxu0 %v679_v62 }
  0x78   :  { %502 = vmatpush1.bf16.msra.mxu0 %v677_v63 }
 0x125   :  { %v157_v50 = vpop.f32.mrb[0].mxu0 }
 0x126   :  { %v158_v51 = vadd.f32 %v157_v50, %v92_v48  ;;  %v159_v52 = vpop.f32.mrb[1].mxu0 }
 0x127   :  { %v160_v53 = vadd.f32 %v159_v52, %v96_v49  ;;  %v161_v54 = vpop.f32.mrb[2].mxu0 }
 0x128   :  { %v164_v55 = vmax.f32 %v158_v51, 0.0  ;;  %v162_v56 = vpop.f32.mrb[3].mxu0 }
 0x129   :  { %v165_v57 = vmax.f32 %v160_v53, 0.0 }
 0x12a   :  { %v166_v59 = vpack.c.bf16 %v164_v55, %v164_v55 }
 0x12b   :  { %v167_v58 = vpack.c.bf16 %v165_v57, %v165_v57 }
 0x12d   :  { %581 = vmatprep.mubr.msk.bf16.mxu1 %vm119_vm0, %v167_v58 }
 0x12e   :  { %336 = vmatmul.mubr.bf16.vlgmr.msra.gmra.mrb[0].mxu1 %v166_v59 }
 0x201   :  { %v337_v3 = vpop.f32.mrb[0].mxu1 }
 0x202   :  { %v338_v4 = vadd.f32 %v337_v3, %v193_v1  ;;  %v339_v5 = vpop.f32.mrb[1].mxu1 }
 0x203   :  { %v340_v6 = vadd.f32 %v339_v5, %v197_v2  ;;  %v341_v7 = vpop.f32.mrb[2].mxu1 }
 0x204   :  { %v344_v8 = vmax.f32 %v338_v4, 0.0  ;;  %v342_v9 = vpop.f32.mrb[3].mxu1 }
 0x205   :  { %v345_v10 = vmax.f32 %v340_v6, 0.0 }
 0x206   :  { %v346_v12 = vpack.c.bf16 %v344_v8, %v344_v8 }
 0x207   :  { %v347_v11 = vpack.c.bf16 %v345_v10, %v345_v10 }
 0x209   :  { %602 = vmatprep.mubr.msk.bf16.mxu0 %vm119_vm0, %v347_v11 }
 0x20a   :  { %516 = vmatmul.mubr.bf16.vlgmr.msra.gmra.mrb[4].mxu0 %v346_v12 }
 0x2dd   :  { %v517_v16 = vpop.f32.mrb[4].mxu0 }
 0x2de   :  { %v518_v17 = vadd.f32 %v517_v16, %v373_v14  ;;  %v519_v18 = vpop.f32.mrb[5].mxu0 }
 0x2df   :  { %v520_v19 = vadd.f32 %v519_v18, %v377_v15  ;;  %v521_v20 = vpop.f32.mrb[6].mxu0 }
 0x2e0   :  { %537 = vst [vmem:[#allocation10 + $0x8] sm:$0xff] %v518_v17  ;;  %v522_v21 = vpop.f32.mrb[7].mxu0  ;;  %530 = vrot.lane.b32.xlu1 %v518_v17, %s805_s4  ;;  %524 = vrot.lane.b32.xlu0 %v518_v17, %s806_s28 }
 0x2e1   :  { %538 = vst.msk [vmem:[#allocation10 + $0x10] sm:$0xff] %vm119_vm0, %v520_v19  ;;  %v533_v28 = vadd.f32 %v520_v19, %v518_v17 }
 0x2e4   :  { %527 = vrot.lane.b32.xlu0 %v518_v17, %s807_s29 }
 0x352   :  { %v525_v22 = vpop.permute.xlu0 %524  ;;  %v531_v26 = vpop.permute.xlu1 %530 }
 0x353   :  { %v526_v23 = vadd.f32 %v525_v22, %v518_v17 }
 0x356   :  { %v528_v24 = vpop.permute.xlu0 %527 }
 0x357   :  { %v529_v25 = vadd.f32 %v528_v24, %v526_v23 }
 0x359   :  { %v532_v27 = vadd.f32 %v531_v26, %v529_v25 }
 0x35b   :  { %v534_v29 = vmul.f32 0.25, %v532_v27 }
 0x35d   :  { %v535_v30 = vsub.f32 %v533_v28, %v534_v29 }
 0x35f   :  { %536 = vst [vmem:[#allocation10] sm:$0xff] %v535_v30 }
 0x360   :  { %779 = shalt.err (!%p776_p8)
}
 0x361   :  { %s780_s13 = scalar_lea.hbm %s938_s7, 384 }
 0x362   :  { %p781_p9 = scmp.ne.s32.totalorder %s938_s7, %s780_s13  ;;  %p784_p10 = scmp.lt.u32.totalorder %s780_s13, %s938_s7 }
 0x364   :  { %p786_p11 = pnand %p784_p10, %p781_p9 }
 0x366   :  { %789 = shalt.err (!%p786_p11)
}
 0x367   :  { %548 = dma.vmem_to_hbm [thread:$0]  %s546_s30, 384, %s938_s7, [#allocation4]  }
 0x368   :  { %796 = dma.done.wait [#allocation4], 384  }
 0x369   :  { %797 = vsyncadd [#allocation4], 4294966912 }
 0x36a   :  { %552 = vsyncpa [#allocation3], 1 }
 0x36b   :  { %553 = vsyncpa [#allocation6], 1 }
 0x36c   :  { %554 = vsyncpa [#allocation9], 1 }
 0x36d   :  { %555 = vsyncpa [#allocation4], 1 }

</bundles_post_ra>
